<compile_context>
chip_gen: v7x
topology: tpu7x:2x2x1
jax: 0.10.0
libtpu: 0.0.40
codegen_flags: <defaults>
</compile_context>

<pallas_src>
import jax
import jax.numpy as jnp
from jax.experimental import pallas as pl
from jax.experimental.pallas import tpu as pltpu

IN_FEATURES = 28 * 28   # 784
OUT_FEATURES = 10
PAD_OUT = 128           # lane-dense class dimension for the MXU / reductions


def _round_up(n, m):
    return ((n + m - 1) // m) * m


def netlin_kernel(x_ref, w_ref, b_ref, o_ref):
    # x_ref: (TB, 784) compute dtype; w_ref: (784, 128) compute dtype
    # b_ref: (1, 128) f32 (padded entries = -1e30); o_ref: (TB, 10) f32
    logits = jnp.dot(
        x_ref[...], w_ref[...], preferred_element_type=jnp.float32
    ) + b_ref[...]
    # Numerically-stable log-softmax along the (padded) class axis; padded
    # columns carry -1e30 so exp() underflows to 0 and they never contribute
    # to the row max or the logsumexp.
    m = jnp.max(logits, axis=-1, keepdims=True)
    shifted = logits - m
    lse = jnp.log(jnp.sum(jnp.exp(shifted), axis=-1, keepdims=True))
    # Store only the 10 real classes (narrow writeback).
    o_ref[...] = (shifted[:, :OUT_FEATURES] - lse).astype(o_ref.dtype)


def netlin_forward(x, weight, bias, *, block_batch=2048, compute_dtype=None):
    """x: (B, 1, 28, 28); weight: (10, 784); bias: (10,). Returns (B, 10) f32.

    compute_dtype=None streams x as-is (no extra cast pass over HBM). Passing
    e.g. jnp.bfloat16 on an f32 input forces a separate cast pass and is only
    worthwhile if the cast fuses into an upstream producer.
    """
    B = x.shape[0]
    x2d = x.reshape(B, -1)                                # == x.view(B, -1)
    if compute_dtype is not None and x2d.dtype != jnp.dtype(compute_dtype):
        x2d = x2d.astype(compute_dtype)                   # explicit opt-in only
    cdtype = x2d.dtype

    # Sublane-aligned batch tile (bf16 packs 16 rows per vreg group).
    sublane = 16 if cdtype == jnp.bfloat16 else 8
    if B > 2 * block_batch:
        TB = _round_up(block_batch, sublane)
    else:
        # Small/medium batch: aim for >= 2 grid steps (v7x megacore) while
        # keeping the tile sublane-aligned.
        TB = max(sublane, _round_up(pl.cdiv(B, 2), sublane))
        TB = min(TB, _round_up(block_batch, sublane))
    grid = (pl.cdiv(B, TB),)                              # partial last block OK

    # Lane-dense class dim for compute: weight (784, 128) with zero-padded
    # columns, bias (1, 128) with -1e30 in the padded slots. Transpose folded
    # into this tiny (10x784) prep.
    w_pad = jnp.zeros((IN_FEATURES, PAD_OUT), dtype=cdtype)
    w_pad = w_pad.at[:, :OUT_FEATURES].set(weight.T.astype(cdtype))
    b_pad = jnp.full((1, PAD_OUT), -1e30, dtype=jnp.float32)
    b_pad = b_pad.at[:, :OUT_FEATURES].set(bias.astype(jnp.float32)[None, :])

    itemsize = jnp.dtype(cdtype).itemsize

    return pl.pallas_call(
        netlin_kernel,
        out_shape=jax.ShapeDtypeStruct((B, OUT_FEATURES), jnp.float32),
        grid=grid,
        in_specs=[
            pl.BlockSpec((TB, IN_FEATURES), lambda i: (i, 0)),
            pl.BlockSpec((IN_FEATURES, PAD_OUT), lambda i: (0, 0)),
            pl.BlockSpec((1, PAD_OUT), lambda i: (0, 0)),
        ],
        out_specs=pl.BlockSpec((TB, OUT_FEATURES), lambda i: (i, 0)),
        compiler_params=pltpu.CompilerParams(
            dimension_semantics=("parallel",),
            vmem_limit_bytes=32 * 1024 * 1024,
        ),
        cost_estimate=pl.CostEstimate(
            flops=2 * B * IN_FEATURES * PAD_OUT,
            bytes_accessed=(B * IN_FEATURES * itemsize
                            + IN_FEATURES * PAD_OUT * itemsize
                            + PAD_OUT * 4
                            + B * OUT_FEATURES * 4),
            transcendentals=B * PAD_OUT,
        ),
    )(x2d, w_pad, b_pad)


if __name__ == "__main__":
    key = jax.random.PRNGKey(0)
    kx, kw, kb = jax.random.split(key, 3)

    # Deterministic parameter init (shapes from nn.Linear(784, 10)):
    bound = 1.0 / (IN_FEATURES ** 0.5)
    weight = jax.random.uniform(
        kw, (OUT_FEATURES, IN_FEATURES), dtype=jnp.float32,
        minval=-bound, maxval=bound)
    bias = jax.random.uniform(
        kb, (OUT_FEATURES,), dtype=jnp.float32, minval=-bound, maxval=bound)

    def reference(x):
        logits = x.reshape(x.shape[0], -1).astype(jnp.float32) @ weight.T + bias
        return jax.nn.log_softmax(logits, axis=-1)

    # --- small-batch f32 check (single tile) ---
    B = 8
    x = jax.random.normal(kx, (B, 1, 28, 28), dtype=jnp.float32)
    out = netlin_forward(x, weight, bias)
    jax.block_until_ready(out)
    assert out.shape == (B, OUT_FEATURES)
    assert jnp.allclose(out, reference(x), atol=1e-5, rtol=1e-5)

    # --- ragged batch check: cdiv grid, partial last block, >= 2 steps ---
    B2 = 37
    x2 = jax.random.normal(kx, (B2, 1, 28, 28), dtype=jnp.float32)
    out2 = netlin_forward(x2, weight, bias, block_batch=16)
    jax.block_until_ready(out2)
    assert out2.shape == (B2, OUT_FEATURES)
    assert jnp.allclose(out2, reference(x2), atol=1e-5, rtol=1e-5)

    # --- bf16 input produced "upstream" (no wrapper cast pass; f32 accumulate) ---
    x_bf16 = x.astype(jnp.bfloat16)
    out_bf16 = netlin_forward(x_bf16, weight, bias)
    jax.block_until_ready(out_bf16)
    assert out_bf16.shape == (B, OUT_FEATURES)
    assert bool(jnp.all(jnp.isfinite(out_bf16)))
    assert jnp.allclose(out_bf16, reference(x), atol=5e-2, rtol=5e-2)

    print("KERNEL_OK")
</pallas_src>

<mosaic_0001>
module attributes {stable_mosaic.version = 11 : i64} {
  func.func @netlin_kernel(%arg0: i32, %arg1: memref<8x784xf32, #tpu.memory_space<vmem>>, %arg2: memref<784x128xf32, #tpu.memory_space<vmem>>, %arg3: memref<1x128xf32, #tpu.memory_space<vmem>>, %arg4: memref<8x10xf32, #tpu.memory_space<vmem>>) attributes {dimension_semantics = [#tpu.dimension_semantics<parallel>], iteration_bounds = array<i64: 1>, scalar_prefetch = 0 : i64, scratch_operands = 0 : i64, tpu.core_type = #tpu.core_type<tc>, window_params = [{transform_indices = @transform_0, window_bounds = array<i64: 8, 784>}, {pipeline_mode = #tpu.pipeline_mode<synchronous>, transform_indices = @transform_1, window_bounds = array<i64: 784, 128>}, {pipeline_mode = #tpu.pipeline_mode<synchronous>, transform_indices = @transform_2, window_bounds = array<i64: 1, 128>}, {transform_indices = @transform_3, window_bounds = array<i64: 8, 10>}]} {
    %c0 = arith.constant 0 : index
    %c0_0 = arith.constant 0 : index
    %0 = vector.load %arg1[%c0, %c0_0] : memref<8x784xf32, #tpu.memory_space<vmem>>, vector<8x784xf32>
    %c0_1 = arith.constant 0 : index
    %c0_2 = arith.constant 0 : index
    %1 = vector.load %arg2[%c0_1, %c0_2] : memref<784x128xf32, #tpu.memory_space<vmem>>, vector<784x128xf32>
    %cst = arith.constant dense<0.000000e+00> : vector<8x128xf32>
    %2 = tpu.matmul %0, %1, %cst {dimension_numbers = #tpu.dot_dimension_numbers<[1], [0], [0], [1], [0, 0, 1, 1], [], []>} : vector<8x784xf32>, vector<784x128xf32>, vector<8x128xf32> -> vector<8x128xf32>
    %c0_3 = arith.constant 0 : index
    %c0_4 = arith.constant 0 : index
    %3 = vector.load %arg3[%c0_3, %c0_4] : memref<1x128xf32, #tpu.memory_space<vmem>>, vector<1x128xf32>
    %4 = vector.broadcast %3 : vector<1x128xf32> to vector<8x128xf32>
    %5 = arith.addf %2, %4 : vector<8x128xf32>
    %cst_5 = arith.constant dense<0xFF800000> : vector<8xf32>
    %6 = vector.multi_reduction <maximumf>, %5, %cst_5 [1] : vector<8x128xf32> to vector<8xf32>
    %7 = vector.shape_cast %6 : vector<8xf32> to vector<8x1xf32>
    %8 = vector.broadcast %7 : vector<8x1xf32> to vector<8x128xf32>
    %9 = arith.subf %5, %8 : vector<8x128xf32>
    %10 = math.exp %9 : vector<8x128xf32>
    %cst_6 = arith.constant dense<0.000000e+00> : vector<8xf32>
    %11 = vector.multi_reduction <add>, %10, %cst_6 [1] : vector<8x128xf32> to vector<8xf32>
    %12 = vector.shape_cast %11 : vector<8xf32> to vector<8x1xf32>
    %13 = math.log %12 : vector<8x1xf32>
    %14 = vector.extract_strided_slice %9 {offsets = [0, 0], sizes = [8, 10], strides = [1, 1]} : vector<8x128xf32> to vector<8x10xf32>
    %15 = vector.broadcast %13 : vector<8x1xf32> to vector<8x10xf32>
    %16 = arith.subf %14, %15 : vector<8x10xf32>
    %c0_7 = arith.constant 0 : index
    %c0_8 = arith.constant 0 : index
    %17 = vector.load %arg4[%c0_7, %c0_8] : memref<8x10xf32, #tpu.memory_space<vmem>>, vector<8x10xf32>
    tpu.vector_store %arg4[%c0_7, %c0_8], %16 {strides = array<i32>} : memref<8x10xf32, #tpu.memory_space<vmem>>, vector<8x10xf32>,
    return
  }
  func.func @transform_0(%arg0: i32) -> (i32, i32) {
    %c0_i32 = arith.constant 0 : i32
    %c0_i32_0 = arith.constant 0 : i32
    return %arg0, %c0_i32 : i32, i32
  }
  func.func @transform_1(%arg0: i32) -> (i32, i32) {
    %c0_i32 = arith.constant 0 : i32
    %c0_i32_0 = arith.constant 0 : i32
    %c0_i32_1 = arith.constant 0 : i32
    return %c0_i32, %c0_i32_0 : i32, i32
  }
  func.func @transform_2(%arg0: i32) -> (i32, i32) {
    %c0_i32 = arith.constant 0 : i32
    %c0_i32_0 = arith.constant 0 : i32
    %c0_i32_1 = arith.constant 0 : i32
    return %c0_i32, %c0_i32_0 : i32, i32
  }
  func.func @transform_3(%arg0: i32) -> (i32, i32) {
    %c0_i32 = arith.constant 0 : i32
    %c0_i32_0 = arith.constant 0 : i32
    return %arg0, %c0_i32 : i32, i32
  }
}

</mosaic_0001>

<bundles_post_ra>
// kernel: tpu_custom_call.1
= control target key start
LH: loop header
LB: loop body
LE: loop exit
PB: predicated region body
PF: predicated region fallthrough
CT: control target
= control target key end

     0   :  { %8 = vsyncpa [#allocation3], 0  ;;  %s839_s0 = inlined_call_operand.hbm [shape: f32[8,784], index: 0, kind: input, shape index: {}]   ;;  %s840_s1 = inlined_call_operand.hbm [shape: f32[784,128], index: 1, kind: input, shape index: {}]   ;;  %s841_s2 = inlined_call_operand.vmem [shape: f32[1,128], index: 2, kind: input, shape index: {}]   ;;  %s842_s3 = inlined_call_operand.hbm [shape: f32[8,10], index: 3, kind: output, shape index: {}]  }
   0x1   :  { %9 = vsyncpa [#allocation6], 0 }
   0x2   :  { %10 = vsyncpa [#allocation4], 0  ;;  %s765_s12 = smov [#allocation2]   ;;  %s766_s14 = smov [#allocation5]  }
   0x3   :  { %s17_s13 = sshll.u32 %s765_s12, 4  ;;  %s26_s15 = sshll.u32 %s766_s14, 4  ;;  %s18_s13 = int_to_ptr.vmem [resolvable:$true] %s17_s13  ;;  %s793_s15 = int_to_ptr.vmem [resolvable:$true] %s26_s15 }
   0x4   :  { %s693_s18 = scalar_lea.hbm %s839_s0, 896 }
   0x5   :  { %p694_p0 = scmp.ne.s32.totalorder %s839_s0, %s693_s18  ;;  %p697_p1 = scmp.lt.u32.totalorder %s693_s18, %s839_s0 }
   0x7   :  { %p699_p2 = pnand %p697_p1, %p694_p0 }
   0x9   :  { %702 = shalt.err (!%p699_p2)
}
   0xa   :  { %s703_s23 = scalar_lea.vmem %s18_s13, 896  ;;  %p708_p4 = scmp.lt.s32.totalorder %s18_s13, %s18_s13 }
   0xb   :  { %p704_p3 = scmp.ne.s32.totalorder %s18_s13, %s703_s23  ;;  %p709_p5 = scmp.lt.s32.totalorder %s703_s23, %s703_s23 }
   0xd   :  { %p710_p6 = por %p709_p5, %p708_p4 }
   0xf   :  { %p711_p7 = pnand %p710_p6, %p704_p3 }
  0x11   :  { %714 = shalt.err (!%p711_p7)
}
  0x12   :  { %20 = dma.hbm_to_vmem [thread:$0]  %s839_s0, 896, %s18_s13, [#allocation3]  }
  0x13   :  { %s715_s28 = scalar_lea.hbm %s840_s1, 12544 }
  0x14   :  { %p716_p8 = scmp.ne.s32.totalorder %s840_s1, %s715_s28  ;;  %p719_p9 = scmp.lt.u32.totalorder %s715_s28, %s840_s1 }
  0x16   :  { %p721_p10 = pnand %p719_p9, %p716_p8 }
  0x18   :  { %724 = shalt.err (!%p721_p10)
}
  0x19   :  { %s725_s6 = scalar_lea.vmem %s793_s15, 12544  ;;  %p730_p12 = scmp.lt.s32.totalorder %s793_s15, %s793_s15 }
  0x1a   :  { %p726_p11 = scmp.ne.s32.totalorder %s793_s15, %s725_s6  ;;  %p731_p13 = scmp.lt.s32.totalorder %s725_s6, %s725_s6 }
  0x1c   :  { %p732_p0 = por %p731_p13, %p730_p12 }
  0x1e   :  { %p733_p1 = pnand %p732_p0, %p726_p11 }
  0x20   :  { %736 = shalt.err (!%p733_p1)
}
  0x21   :  { %s767_s0 = smov 128   ;;  %s768_s7 = smov 8  }
  0x22   :  { %32 = dma.hbm_to_vmem [thread:$0]  %s840_s1, 12544, %s793_s15, [#allocation6], %s767_s0, %s767_s0, %s768_s7  }
  0x23   :  { %759 = dma.done.wait [#allocation3], 896  }
  0x24   :  { %760 = vsyncadd [#allocation3], 4294966400 }
  0x25   :  { %761 = dma.done.wait [#allocation6], 12544  }
  0x26   :  { %762 = vsyncadd [#allocation6], 4294954752  ;;  %v64_v0 = vld [vmem:[#allocation5 + $0x80] sm:$0xff]  ;;  %v65_v1 = vld [vmem:[#allocation5 + $0x88] sm:$0xff]  ;;  %vm770_vm0 = vmmov 0   ;;  %vm153_vm1 = vcmask 130048  }
  0x27   :  { %v48_v2 = vld [vmem:[#allocation5] sm:$0xff]  ;;  %v582_v3 = vpack.c.bf16 %v65_v1, %v64_v0  ;;  %v49_v4 = vld [vmem:[#allocation5 + $0x8] sm:$0xff]  ;;  %v66_v11 = vld [vmem:[#allocation5 + $0x90] sm:$0xff]  ;;  %vm447_vm2 = vcmask 80896  }
  0x28   :  { %v96_v5 = vld [vmem:[#allocation5 + $0x180] sm:$0xff]  ;;  %v97_v6 = vld [vmem:[#allocation5 + $0x188] sm:$0xff]  ;;  %v584_v7 = vpack.c.bf16 %v49_v4, %v48_v2  ;;  %v67_v13 = vld [vmem:[#allocation5 + $0x98] sm:$0xff] }
  0x29   :  { %v614_v8 = vpack.c.bf16 %v97_v6, %v96_v5  ;;  %v80_v9 = vld [vmem:[#allocation5 + $0x100] sm:$0xff]  ;;  %v81_v10 = vld [vmem:[#allocation5 + $0x108] sm:$0xff]  ;;  %583 = vmatprep.subr.bf16.mxu0 %v582_v3  ;;  %v50_v14 = vld [vmem:[#allocation5 + $0x10] sm:$0xff]  ;;  %v586_v16 = vpack.c.bf16 %v67_v13, %v66_v11 }
  0x2a   :  { %v616_v12 = vpack.c.bf16 %v81_v10, %v80_v9  ;;  %v51_v15 = vld [vmem:[#allocation5 + $0x18] sm:$0xff]  ;;  %585 = vmatpush3.bf16.msra.mxu0 %v584_v7  ;;  %v98_v18 = vld [vmem:[#allocation5 + $0x190] sm:$0xff]  ;;  %v68_v23 = vld [vmem:[#allocation5 + $0xa0] sm:$0xff] }
  0x2b   :  { %615 = vmatprep.subr.bf16.mxu1 %v614_v8  ;;  %v588_v17 = vpack.c.bf16 %v51_v15, %v50_v14  ;;  %v99_v19 = vld [vmem:[#allocation5 + $0x198] sm:$0xff]  ;;  %v82_v20 = vld [vmem:[#allocation5 + $0x110] sm:$0xff]  ;;  %v69_v24 = vld [vmem:[#allocation5 + $0xa8] sm:$0xff]  ;;  %587 = vmatprep.subr.bf16.mxu0 %v586_v16 }
  0x2c   :  { %617 = vmatpush3.bf16.msra.mxu1 %v616_v12  ;;  %v618_v21 = vpack.c.bf16 %v99_v19, %v98_v18  ;;  %v83_v22 = vld [vmem:[#allocation5 + $0x118] sm:$0xff]  ;;  %v590_v26 = vpack.c.bf16 %v69_v24, %v68_v23  ;;  %v52_v27 = vld [vmem:[#allocation5 + $0x20] sm:$0xff]  ;;  %v53_v28 = vld [vmem:[#allocation5 + $0x28] sm:$0xff] }
  0x2d   :  { %v620_v25 = vpack.c.bf16 %v83_v22, %v82_v20  ;;  %v100_v29 = vld [vmem:[#allocation5 + $0x1a0] sm:$0xff]  ;;  %v101_v30 = vld [vmem:[#allocation5 + $0x1a8] sm:$0xff]  ;;  %v592_v33 = vpack.c.bf16 %v53_v28, %v52_v27  ;;  %v70_v35 = vld [vmem:[#allocation5 + $0xb0] sm:$0xff] }
  0x2e   :  { %619 = vmatprep.subr.bf16.mxu1 %v618_v21  ;;  %v84_v31 = vld [vmem:[#allocation5 + $0x120] sm:$0xff]  ;;  %v85_v32 = vld [vmem:[#allocation5 + $0x128] sm:$0xff]  ;;  %589 = vmatpush3.bf16.msra.mxu0 %v588_v17  ;;  %v622_v34 = vpack.c.bf16 %v101_v30, %v100_v29  ;;  %v71_v36 = vld [vmem:[#allocation5 + $0xb8] sm:$0xff] }
  0x2f   :  { %v54_v37 = vld [vmem:[#allocation5 + $0x30] sm:$0xff]  ;;  %591 = vmatprep.subr.bf16.mxu0 %v590_v26  ;;  %v624_v38 = vpack.c.bf16 %v85_v32, %v84_v31  ;;  %v594_v39 = vpack.c.bf16 %v71_v36, %v70_v35  ;;  %v55_v40 = vld [vmem:[#allocation5 + $0x38] sm:$0xff]  ;;  %v72_v46 = vld [vmem:[#allocation5 + $0xc0] sm:$0xff] }
  0x30   :  { %621 = vmatpush3.bf16.msra.mxu1 %v620_v25  ;;  %v102_v41 = vld [vmem:[#allocation5 + $0x1b0] sm:$0xff]  ;;  %v103_v42 = vld [vmem:[#allocation5 + $0x1b8] sm:$0xff]  ;;  %v73_v47 = vld [vmem:[#allocation5 + $0xc8] sm:$0xff]  ;;  %v596_v48 = vpack.c.bf16 %v55_v40, %v54_v37 }
  0x31   :  { %623 = vmatprep.subr.bf16.mxu1 %v622_v34  ;;  %v626_v43 = vpack.c.bf16 %v103_v42, %v102_v41  ;;  %v86_v44 = vld [vmem:[#allocation5 + $0x130] sm:$0xff]  ;;  %v87_v45 = vld [vmem:[#allocation5 + $0x138] sm:$0xff]  ;;  %v104_v49 = vld [vmem:[#allocation5 + $0x1c0] sm:$0xff]  ;;  %v598_v52 = vpack.c.bf16 %v73_v47, %v72_v46 }
  0x32   :  { %593 = vmatpush3.bf16.msra.mxu0 %v592_v33  ;;  %v105_v50 = vld [vmem:[#allocation5 + $0x1c8] sm:$0xff]  ;;  %v628_v51 = vpack.c.bf16 %v87_v45, %v86_v44  ;;  %v56_v53 = vld [vmem:[#allocation5 + $0x40] sm:$0xff]  ;;  %v74_v58 = vld [vmem:[#allocation5 + $0xd0] sm:$0xff] }
  0x33   :  { %595 = vmatprep.subr.bf16.mxu0 %v594_v39  ;;  %v57_v54 = vld [vmem:[#allocation5 + $0x48] sm:$0xff]  ;;  %v88_v55 = vld [vmem:[#allocation5 + $0x140] sm:$0xff]  ;;  %v630_v56 = vpack.c.bf16 %v105_v50, %v104_v49  ;;  %v75_v59 = vld [vmem:[#allocation5 + $0xd8] sm:$0xff]  ;;  %v769_v50 = vmov 0.0|0.0  }
  0x34   :  { %625 = vmatpush3.bf16.msra.mxu1 %v624_v38  ;;  %v89_v57 = vld [vmem:[#allocation5 + $0x148] sm:$0xff]  ;;  %v106_v60 = vld [vmem:[#allocation5 + $0x1d0] sm:$0xff]  ;;  %v107_v61 = vld [vmem:[#allocation5 + $0x1d8] sm:$0xff]  ;;  %v600_v62 = vpack.c.bf16 %v57_v54, %v56_v53  ;;  %v602_v0 = vpack.c.bf16 %v75_v59, %v74_v58 }
  0x35   :  { %627 = vmatprep.subr.bf16.mxu1 %v626_v43  ;;  %v632_v63 = vpack.c.bf16 %v89_v57, %v88_v55  ;;  %v58_v1 = vld [vmem:[#allocation5 + $0x50] sm:$0xff]  ;;  %v59_v2 = vld [vmem:[#allocation5 + $0x58] sm:$0xff]  ;;  %v634_v4 = vpack.c.bf16 %v107_v61, %v106_v60  ;;  %v76_v6 = vld [vmem:[#allocation5 + $0xe0] sm:$0xff]  ;;  %v771_v60 = vmov 0.0  }
  0x36   :  { %597 = vmatpush3.bf16.msra.mxu0 %v596_v48  ;;  %v90_v3 = vld [vmem:[#allocation5 + $0x150] sm:$0xff]  ;;  %v91_v5 = vld [vmem:[#allocation5 + $0x158] sm:$0xff]  ;;  %v77_v7 = vld [vmem:[#allocation5 + $0xe8] sm:$0xff]  ;;  %v604_v10 = vpack.c.bf16 %v59_v2, %v58_v1 }
  0x37   :  { %599 = vmatprep.subr.bf16.mxu0 %v598_v52  ;;  %v108_v8 = vld [vmem:[#allocation5 + $0x1e0] sm:$0xff]  ;;  %v109_v9 = vld [vmem:[#allocation5 + $0x1e8] sm:$0xff]  ;;  %v42_v12 = vld [vmem:[#allocation2 + $0x8] sm:$0xff]  ;;  %v636_v13 = vpack.c.bf16 %v91_v5, %v90_v3  ;;  %v606_v14 = vpack.c.bf16 %v77_v7, %v76_v6 }
  0x38   :  { %629 = vmatpush3.bf16.msra.mxu1 %v628_v51  ;;  %v60_v11 = vld [vmem:[#allocation5 + $0x60] sm:$0xff]  ;;  %v61_v15 = vld [vmem:[#allocation5 + $0x68] sm:$0xff]  ;;  %v638_v18 = vpack.c.bf16 %v109_v9, %v108_v8  ;;  %v78_v19 = vld [vmem:[#allocation5 + $0xf0] sm:$0xff]  ;;  %221 = vmatprep.mubr.f32.mxu0 %v42_v12 }
  0x39   :  { %631 = vmatprep.subr.bf16.mxu1 %v630_v56  ;;  %v92_v16 = vld [vmem:[#allocation5 + $0x160] sm:$0xff]  ;;  %v93_v17 = vld [vmem:[#allocation5 + $0x168] sm:$0xff]  ;;  %v79_v20 = vld [vmem:[#allocation5 + $0xf8] sm:$0xff]  ;;  %v608_v24 = vpack.c.bf16 %v61_v15, %v60_v11 }
  0x3a   :  { %601 = vmatpush3.bf16.msra.mxu0 %v600_v62  ;;  %v44_v21 = vld [vmem:[#allocation2 + $0x18] sm:$0xff]  ;;  %v110_v22 = vld [vmem:[#allocation5 + $0x1f0] sm:$0xff]  ;;  %v111_v23 = vld [vmem:[#allocation5 + $0x1f8] sm:$0xff]  ;;  %v640_v25 = vpack.c.bf16 %v93_v17, %v92_v16  ;;  %v610_v26 = vpack.c.bf16 %v79_v20, %v78_v19 }
  0x3b   :  { %603 = vmatprep.subr.bf16.mxu0 %v602_v0  ;;  %291 = vmatprep.mubr.f32.mxu1 %v44_v21  ;;  %v62_v27 = vld [vmem:[#allocation5 + $0x70] sm:$0xff]  ;;  %v63_v28 = vld [vmem:[#allocation5 + $0x78] sm:$0xff]  ;;  %v642_v30 = vpack.c.bf16 %v111_v23, %v110_v22  ;;  %v128_v32 = vld [vmem:[#allocation5 + $0x280] sm:$0xff] }
  0x3c   :  { %633 = vmatpush3.bf16.msra.mxu1 %v632_v63  ;;  %v94_v29 = vld [vmem:[#allocation5 + $0x170] sm:$0xff]  ;;  %v95_v31 = vld [vmem:[#allocation5 + $0x178] sm:$0xff]  ;;  %v129_v33 = vld [vmem:[#allocation5 + $0x288] sm:$0xff]  ;;  %v612_v34 = vpack.c.bf16 %v63_v28, %v62_v27 }
  0x3d   :  { %635 = vmatprep.subr.bf16.mxu1 %v634_v4  ;;  %v644_v35 = vpack.c.bf16 %v95_v31, %v94_v29  ;;  %v646_v36 = vpack.c.bf16 %v129_v33, %v128_v32  ;;  %v112_v37 = vld [vmem:[#allocation5 + $0x200] sm:$0xff]  ;;  %v113_v38 = vld [vmem:[#allocation5 + $0x208] sm:$0xff]  ;;  %v130_v39 = vld [vmem:[#allocation5 + $0x290] sm:$0xff] }
  0x3e   :  { %605 = vmatpush3.bf16.msra.mxu0 %v604_v10  ;;  %v131_v40 = vld [vmem:[#allocation5 + $0x298] sm:$0xff]  ;;  %v41_v41 = vld [vmem:[#allocation2] sm:$0xff]  ;;  %v648_v42 = vpack.c.bf16 %v113_v38, %v112_v37  ;;  %v114_v44 = vld [vmem:[#allocation5 + $0x210] sm:$0xff] }
  0x3f   :  { %607 = vmatprep.subr.bf16.mxu0 %v606_v14  ;;  %v43_v43 = vld [vmem:[#allocation2 + $0x10] sm:$0xff]  ;;  %v650_v45 = vpack.c.bf16 %v131_v40, %v130_v39  ;;  %v132_v47 = vld [vmem:[#allocation5 + $0x2a0] sm:$0xff]  ;;  %v133_v48 = vld [vmem:[#allocation5 + $0x2a8] sm:$0xff] }
  0x40   :  { %637 = vmatpush3.bf16.msra.mxu1 %v636_v13  ;;  %v115_v46 = vld [vmem:[#allocation5 + $0x218] sm:$0xff]  ;;  %v46_v49 = vld [vmem:[#allocation2 + $0x28] sm:$0xff]  ;;  %v144_v51 = vld [vmem:[#allocation5 + $0x300] sm:$0xff]  ;;  %v654_v55 = vpack.c.bf16 %v133_v48, %v132_v47 }
  0x41   :  { %639 = vmatprep.subr.bf16.mxu1 %v638_v18  ;;  %v145_v52 = vld [vmem:[#allocation5 + $0x308] sm:$0xff]  ;;  %v652_v54 = vpack.c.bf16 %v115_v46, %v114_v44  ;;  %v116_v56 = vld [vmem:[#allocation5 + $0x220] sm:$0xff]  ;;  %v134_v58 = vld [vmem:[#allocation5 + $0x2b0] sm:$0xff] }
  0x42   :  { %609 = vmatpush3.bf16.msra.mxu0 %v608_v24  ;;  %v679_v53 = vpack.c.bf16 %v145_v52, %v144_v51  ;;  %v117_v57 = vld [vmem:[#allocation5 + $0x228] sm:$0xff]  ;;  %v135_v59 = vld [vmem:[#allocation5 + $0x2b8] sm:$0xff]  ;;  %v118_v0 = vld [vmem:[#allocation5 + $0x230] sm:$0xff] }
  0x43   :  { %611 = vmatprep.subr.bf16.mxu0 %v610_v26  ;;  %v47_v61 = vld [vmem:[#allocation2 + $0x30] sm:$0xff]  ;;  %v656_v62 = vpack.c.bf16 %v117_v57, %v116_v56  ;;  %v658_v63 = vpack.c.bf16 %v135_v59, %v134_v58  ;;  %v136_v2 = vld [vmem:[#allocation5 + $0x2c0] sm:$0xff]  ;;  %v137_v3 = vld [vmem:[#allocation5 + $0x2c8] sm:$0xff] }
  0x44   :  { %641 = vmatpush3.bf16.msra.mxu1 %v640_v25  ;;  %v119_v1 = vld [vmem:[#allocation5 + $0x238] sm:$0xff]  ;;  %v662_v5 = vpack.c.bf16 %v137_v3, %v136_v2  ;;  %v120_v6 = vld [vmem:[#allocation5 + $0x240] sm:$0xff]  ;;  %v121_v7 = vld [vmem:[#allocation5 + $0x248] sm:$0xff] }
  0x45   :  { %643 = vmatprep.subr.bf16.mxu1 %v642_v30  ;;  %v660_v4 = vpack.c.bf16 %v119_v1, %v118_v0  ;;  %v138_v8 = vld [vmem:[#allocation5 + $0x2d0] sm:$0xff]  ;;  %v139_v9 = vld [vmem:[#allocation5 + $0x2d8] sm:$0xff]  ;;  %v664_v10 = vpack.c.bf16 %v121_v7, %v120_v6  ;;  %v140_v14 = vld [vmem:[#allocation5 + $0x2e0] sm:$0xff] }
  0x46   :  { %613 = vmatpush3.bf16.msra.mxu0 %v612_v34  ;;  %v666_v11 = vpack.c.bf16 %v139_v9, %v138_v8  ;;  %v122_v12 = vld [vmem:[#allocation5 + $0x250] sm:$0xff]  ;;  %v123_v13 = vld [vmem:[#allocation5 + $0x258] sm:$0xff]  ;;  %v141_v15 = vld [vmem:[#allocation5 + $0x2e8] sm:$0xff] }
  0x47   :  { %647 = vmatprep.subr.bf16.mxu0 %v646_v36  ;;  %v668_v16 = vpack.c.bf16 %v123_v13, %v122_v12  ;;  %v670_v17 = vpack.c.bf16 %v141_v15, %v140_v14  ;;  %v124_v18 = vld [vmem:[#allocation5 + $0x260] sm:$0xff]  ;;  %v125_v19 = vld [vmem:[#allocation5 + $0x268] sm:$0xff]  ;;  %v142_v20 = vld [vmem:[#allocation5 + $0x2f0] sm:$0xff] }
  0x48   :  { %645 = vmatpush3.bf16.msra.mxu1 %v644_v35  ;;  %v143_v21 = vld [vmem:[#allocation5 + $0x2f8] sm:$0xff]  ;;  %v672_v22 = vpack.c.bf16 %v125_v19, %v124_v18  ;;  %v126_v24 = vld [vmem:[#allocation5 + $0x270] sm:$0xff]  ;;  %v45_v27 = vld [vmem:[#allocation2 + $0x20] sm:$0xff] }
  0x49   :  { %678 = vmatprep.subr.bf16.mxu1 %v769_v50  ;;  %222 = vmatmul.mubr.f32.vlgmr.msra.gmra.mrb[0].mxu0 %v41_v41  ;;  %v674_v23 = vpack.c.bf16 %v143_v21, %v142_v20  ;;  %v127_v25 = vld [vmem:[#allocation5 + $0x278] sm:$0xff]  ;;  %v465_v29 = vld [vmem:[%s841_s2] ss:$0 sm:$0xff]  ;;  %s772_s2 = smov [#allocation7]  }
  0x4a   :  { %649 = vmatpush3.bf16.msra.mxu0 %v648_v42  ;;  %361 = vmatprep.mubr.f32.mxu0 %v46_v49  ;;  %v676_v26 = vpack.c.bf16 %v127_v25, %v126_v24  ;;  %s455_s11 = sshll.u32 %s772_s2, 4  ;;  %s456_s11 = int_to_ptr.vmem [resolvable:$true] %s455_s11 }
  0x4b   :  { %292 = vmatmul.mubr.f32.vlgmr.msra.gmra.mrb[0].mxu1 %v43_v43  ;;  %651 = vmatprep.subr.bf16.mxu0 %v650_v45  ;;  %s737_s12 = scalar_lea.vmem %s456_s11, 128  ;;  %p742_p3 = scmp.lt.s32.totalorder %s456_s11, %s456_s11 }
  0x4c   :  { %680 = vmatpush3.bf16.msra.mxu1 %v679_v53  ;;  %579 = vmatprep.mubr.msk.f32.mxu1 %vm770_vm0, %v771_v60  ;;  %p738_p2 = scmp.ne.s32.totalorder %s456_s11, %s737_s12  ;;  %p743_p4 = scmp.lt.s32.totalorder %s737_s12, %s737_s12 }
  0x4e   :  { %653 = vmatpush3.bf16.msra.mxu0 %v652_v54  ;;  %p744_p5 = por %p743_p4, %p742_p3 }
  0x4f   :  { %655 = vmatprep.subr.bf16.mxu0 %v654_v55  ;;  %580 = vmatmul.mubr.msk.f32.vlgmr.msra.gmra.mrb[2].mxu1 %vm153_vm1, %v47_v61 }
  0x50   :  { %p745_p6 = pnand %p744_p5, %p738_p2 }
  0x52   :  { %657 = vmatpush3.bf16.msra.mxu0 %v656_v62 }
  0x53   :  { %659 = vmatprep.subr.bf16.mxu0 %v658_v63 }
  0x56   :  { %661 = vmatpush3.bf16.msra.mxu0 %v660_v4 }
  0x57   :  { %663 = vmatprep.subr.bf16.mxu0 %v662_v5 }
  0x5a   :  { %665 = vmatpush3.bf16.msra.mxu0 %v664_v10 }
  0x5b   :  { %667 = vmatprep.subr.bf16.mxu0 %v666_v11 }
  0x5e   :  { %669 = vmatpush3.bf16.msra.mxu0 %v668_v16 }
  0x5f   :  { %671 = vmatprep.subr.bf16.mxu0 %v670_v17 }
  0x62   :  { %673 = vmatpush3.bf16.msra.mxu0 %v672_v22 }
  0x63   :  { %675 = vmatprep.subr.bf16.mxu0 %v674_v23 }
  0x66   :  { %677 = vmatpush3.bf16.msra.mxu0 %v676_v26 }
  0x69   :  { %362 = vmatmul.mubr.f32.vlgmr.msra.gmra.mrb[2].mxu0 %v45_v27 }
 0x11c   :  { %v499_v28 = vpop.f32.mrb[0].mxu0 }
 0x11d   :  { %v500_v30 = vpop.f32.mrb[1].mxu0 }
 0x11e   :  { %v534_v31 = vpop.f32.mrb[0].mxu1  ;;  %v501_v32 = vadd.f32 %v500_v30, %v499_v28 }
 0x11f   :  { %v535_v33 = vpop.f32.mrb[1].mxu1 }
 0x120   :  { %v536_v34 = vadd.f32 %v535_v33, %v534_v31  ;;  %v224_v35 = vadd.f32 %v501_v32, %v465_v29 }
 0x122   :  { %v294_v36 = vadd.f32 %v536_v34, %v224_v35  ;;  %v433_v37 = vpop.f32.mrb[2].mxu1 }
 0x123   :  { %v581_v38 = vpop.f32.mrb[3].mxu1 }
 0x13c   :  { %v569_v39 = vpop.f32.mrb[2].mxu0 }
 0x13d   :  { %v570_v40 = vpop.f32.mrb[3].mxu0 }
 0x13e   :  { %v571_v41 = vadd.f32 %v570_v40, %v569_v39 }
 0x140   :  { %v364_v42 = vadd.f32 %v571_v41, %v294_v36 }
 0x142   :  { %v434_v43 = vadd.f32 %v433_v37, %v364_v42 }
 0x144   :  { %437 = vmax.xlane.f32.xlu0 %v434_v43 }
 0x1d1   :  { %v438_v44 = vpop.xlane.xlu0 %437 }
 0x1d2   :  { %v439_v45 = vsub.f32 %v434_v43, %v438_v44 }
 0x1d4   :  { %v440_v46 = vmul.f32 1.442695, %v439_v45 }
 0x1d6   :  { %689 = vpow2.f32 %v440_v46 }
 0x1e0   :  { %v690_v47 = vpop.eup %689 }
 0x1e1   :  { %442 = vadd.xlane.f32.xlu0 %v690_v47 }
 0x26e   :  { %v443_v48 = vpop.xlane.xlu0 %442 }
 0x26f   :  { %691 = vlog2.f32 %v443_v48 }
 0x279   :  { %v692_v49 = vpop.eup %691 }
 0x27a   :  { %v445_v50 = vmul.f32 0.6931472, %v692_v49 }
 0x27c   :  { %v446_v51 = vsub.f32 %v439_v45, %v445_v50 }
 0x27e   :  { %448 = vst.msk [vmem:[#allocation7] sm:$0xff] %vm447_vm2, %v446_v51 }
 0x27f   :  { %748 = shalt.err (!%p745_p6)
}
 0x280   :  { %s749_s15 = scalar_lea.hbm %s842_s3, 128 }
 0x281   :  { %p750_p7 = scmp.ne.s32.totalorder %s842_s3, %s749_s15  ;;  %p753_p8 = scmp.lt.u32.totalorder %s749_s15, %s842_s3 }
 0x283   :  { %p755_p9 = pnand %p753_p8, %p750_p7 }
 0x285   :  { %758 = shalt.err (!%p755_p9)
}
 0x286   :  { %458 = dma.vmem_to_hbm [thread:$0]  %s456_s11, 128, %s842_s3, [#allocation4]  }
 0x287   :  { %763 = dma.done.wait [#allocation4], 128  }
 0x288   :  { %764 = vsyncadd [#allocation4], 4294967168 }
 0x289   :  { %462 = vsyncpa [#allocation3], 1 }
 0x28a   :  { %463 = vsyncpa [#allocation6], 1 }
 0x28b   :  { %464 = vsyncpa [#allocation4], 1 }

</bundles_post_ra>
